<compile_context>
chip_gen: v6e
topology: v6e:2x2x1
jax: 0.10.0
libtpu: 0.0.40
codegen_flags: <defaults>
</compile_context>

<pallas_src>
import functools

import jax
import jax.numpy as jnp
from jax.experimental import pallas as pl
from jax.experimental.pallas import tpu as pltpu


def _dual_softmax_loss_kernel(sim_ref, lse_ref, diag_ref, m_sc, l_sc, d_sc, *,
                              inv_temp, n_total, tile_n, tiles_per_split):
    s = pl.program_id(0)          # TensorCore split index (size 1 or 2)
    j = pl.program_id(1)          # column tile within this split

    # ---- init running stats (row max / row sum / diag accumulator) ----
    @pl.when(j == 0)
    def _():
        m_sc[...] = jnp.full_like(m_sc, -jnp.inf)
        l_sc[...] = jnp.zeros_like(l_sc)
        d_sc[...] = jnp.zeros_like(d_sc)

    # Cast after the DMA so bf16 inputs travel over HBM at half the bytes.
    sim = sim_ref[...].astype(jnp.float32)                   # (N, tile_n)

    # ---- softmax along dim 0 (exact: every column tile holds all N rows) ----
    # inv_temp > 0, so max(sim*inv_temp) == inv_temp*max(sim); fuse the scale
    # into the exp argument and skip the full-tile `scaled` temporary.
    m0 = jnp.max(sim, axis=0, keepdims=True)                  # (1, tile_n)
    e0 = jnp.exp((sim - m0) * jnp.float32(inv_temp))          # (N, tile_n)
    denom0 = jnp.sum(e0, axis=0, keepdims=True)               # (1, tile_n)
    col_scale = jnp.float32(n_total) / denom0                 # exact divide
    s2 = (sim * e0) * col_scale                                # (N, tile_n)

    # ---- online row log-sum-exp (dim -1) across column tiles ----
    m_old = m_sc[...]                                          # (N, 1)
    m_new = jnp.maximum(m_old, jnp.max(s2, axis=-1, keepdims=True))
    l_sc[...] = (l_sc[...] * jnp.exp(m_old - m_new)
                 + jnp.sum(jnp.exp(s2 - m_new), axis=-1, keepdims=True))
    m_sc[...] = m_new

    # ---- diag(s2) contribution: only rows [row_start, row_start + tile_n) ----
    # (done last so the big s2 / exp(s2-m) temporaries are dead by now)
    col_block = s * tiles_per_split + j
    row_start = col_block * tile_n
    if tile_n % 8 == 0:
        row_start = pl.multiple_of(row_start, 8)
    sim_d = sim_ref[pl.ds(row_start, tile_n), :].astype(jnp.float32)  # (tn, tn)
    s2_d = (sim_d * jnp.exp((sim_d - m0) * jnp.float32(inv_temp))) * col_scale
    rid = jax.lax.broadcasted_iota(jnp.int32, (tile_n, tile_n), 0)
    cid = jax.lax.broadcasted_iota(jnp.int32, (tile_n, tile_n), 1)
    diag_local = jnp.sum(jnp.where(rid == cid, s2_d, 0.0),
                         axis=-1, keepdims=True)               # (tile_n, 1)
    d_sc[pl.ds(row_start, tile_n), :] = diag_local

    # ---- finalize: emit this split's partial row-LSE and diag slabs ----
    @pl.when(j == pl.num_programs(1) - 1)
    def _():
        lse_ref[...] = (m_sc[...] + jnp.log(l_sc[...])).reshape(lse_ref.shape)
        diag_ref[...] = d_sc[...].reshape(diag_ref.shape)


def _vmem_capacity_bytes():
    try:
        return int(pltpu.get_tpu_info().vmem_capacity_bytes)
    except Exception:
        return 64 * 1024 * 1024   # conservative default (v7x per-TC VMEM)


def _working_set_bytes(n, tile_n, in_itemsize):
    """Real per-step VMEM working set for one column tile."""
    full = n * tile_n
    return (2 * full * in_itemsize       # double-buffered input tiles (native dtype)
            + 3 * full * 4               # ~3 live full-tile f32 temporaries
            + 2 * tile_n * tile_n * 4    # diag sub-block temporaries
            + 8 * n * 4)                 # (n,1) scratches + partial output blocks


def _choose_tile_n(n, itemsize, budget_bytes):
    """Largest legal column-tile width whose working set fits the VMEM budget."""
    if n % 128 == 0:
        candidates = [t for t in range(128, n + 1, 128) if n % t == 0]
    else:
        candidates = [n]   # only legal block width when N is not 128-aligned
    fitting = [t for t in candidates
               if _working_set_bytes(n, t, itemsize) <= budget_bytes]
    if not fitting:
        raise ValueError(
            f"dual_softmax_loss: no column tile width for N={n} fits the "
            f"{budget_bytes / 2**20:.0f} MiB VMEM budget; the matrix is too "
            "large for the full-column streaming kernel.")
    return max(fitting)


def _default_num_core_splits():
    # v7x has 2 TensorCores per chip; split the column-tile stream across them.
    try:
        kind = jax.devices()[0].device_kind.lower()
        if "v7" in kind:
            return 2
    except Exception:
        pass
    return 1


def dual_softmax_loss(sim_matrix: jax.Array, temp: float = 1000.0, mask=None, *,
                      tile_n=None, num_core_splits=None) -> jax.Array:
    """Pallas TPU implementation of dual_softmax_loss.forward.

    Returns (N,) f32: -diag(log_softmax(sim * softmax(sim/temp, 0) * N, -1)).
    """
    del mask  # unused in the reference forward
    n, n2 = sim_matrix.shape
    assert n == n2, "sim_matrix must be square"
    itemsize = jnp.dtype(sim_matrix.dtype).itemsize

    cap = _vmem_capacity_bytes()
    base_limit = min(96 * 1024 * 1024, (cap * 3) // 4)   # 96 MiB v5e/v6e, 48 MiB v7x

    if tile_n is None:
        tile_n = _choose_tile_n(n, itemsize, budget_bytes=(base_limit * 4) // 5)
    assert n % tile_n == 0 and (tile_n == n or tile_n % 128 == 0), \
        "tile_n must divide N and be a multiple of 128 (or equal N)"
    num_tiles = n // tile_n

    if num_core_splits is None:
        num_core_splits = _default_num_core_splits()
    if num_core_splits < 1 or num_tiles < num_core_splits \
            or num_tiles % num_core_splits != 0:
        num_core_splits = 1
    tiles_per_split = num_tiles // num_core_splits

    ws = _working_set_bytes(n, tile_n, itemsize)
    vmem_limit = int(min((cap * 9) // 10, max(base_limit, ws + (8 << 20))))

    kernel = functools.partial(_dual_softmax_loss_kernel,
                               inv_temp=1.0 / float(temp), n_total=n,
                               tile_n=tile_n, tiles_per_split=tiles_per_split)

    part_lse, part_diag = pl.pallas_call(
        kernel,
        out_shape=(jax.ShapeDtypeStruct((num_core_splits, n, 1), jnp.float32),
                   jax.ShapeDtypeStruct((num_core_splits, n, 1), jnp.float32)),
        grid_spec=pltpu.PrefetchScalarGridSpec(
            num_scalar_prefetch=0,
            grid=(num_core_splits, tiles_per_split),
            in_specs=[pl.BlockSpec(
                (n, tile_n), lambda s, j: (0, s * tiles_per_split + j))],
            out_specs=[pl.BlockSpec((1, n, 1), lambda s, j: (s, 0, 0)),
                       pl.BlockSpec((1, n, 1), lambda s, j: (s, 0, 0))],
            scratch_shapes=[pltpu.VMEM((n, 1), jnp.float32),   # running row max
                            pltpu.VMEM((n, 1), jnp.float32),   # running row sum
                            pltpu.VMEM((n, 1), jnp.float32)],  # diag accumulator
        ),
        compiler_params=pltpu.CompilerParams(
            dimension_semantics=("parallel", "arbitrary"),  # split axis || cores
            vmem_limit_bytes=vmem_limit,
        ),
    )(sim_matrix)

    # Merge per-split partials: stable log-sum-exp over splits + diag sum
    lse_parts = part_lse[:, :, 0]                          # (S, N)
    m = jnp.max(lse_parts, axis=0)
    lse = m + jnp.log(jnp.sum(jnp.exp(lse_parts - m), axis=0))
    diag = jnp.sum(part_diag[:, :, 0], axis=0)             # (N,)
    return lse - diag                                       # loss = lse - diag(s2)


def _reference(sim, temp=1000.0):
    sim = sim.astype(jnp.float32)
    n = sim.shape[0]
    sm0 = jax.nn.softmax(sim / temp, axis=0)
    s2 = sim * sm0 * n
    logp = jax.nn.log_softmax(s2, axis=-1)
    return -jnp.diag(logp)


if __name__ == "__main__":
    # Small square similarity matrix (batch-vs-batch similarities).
    key = jax.random.PRNGKey(0)
    N = 8
    sim = jax.random.normal(key, (N, N), dtype=jnp.float32)

    loss = jax.block_until_ready(dual_softmax_loss(sim, temp=1000.0))
    ref = _reference(sim, temp=1000.0)
    assert loss.shape == (N,)
    assert jnp.allclose(loss, ref, atol=1e-3, rtol=1e-3), (loss, ref)

    # Multi-tile path (online row LSE across column tiles).
    N2 = 256
    sim2 = jax.random.normal(jax.random.PRNGKey(1), (N2, N2), dtype=jnp.float32)
    loss2 = jax.block_until_ready(dual_softmax_loss(sim2, temp=1000.0, tile_n=128))
    ref2 = _reference(sim2, temp=1000.0)
    assert jnp.allclose(loss2, ref2, atol=1e-3, rtol=1e-3), (loss2, ref2)

    # Exercise the 2-way TensorCore-split path (runs sequentially on 1-TC chips).
    loss3 = jax.block_until_ready(
        dual_softmax_loss(sim2, temp=1000.0, tile_n=128, num_core_splits=2))
    assert jnp.allclose(loss3, ref2, atol=1e-3, rtol=1e-3), (loss3, ref2)

    print("KERNEL_OK")
</pallas_src>

<mosaic_0001>
module attributes {stable_mosaic.version = 11 : i64} {
  func.func @_dual_softmax_loss_kernel(%arg0: i32, %arg1: i32, %arg2: memref<8x8xf32, #tpu.memory_space<vmem>>, %arg3: memref<1x8x1xf32, #tpu.memory_space<vmem>>, %arg4: memref<1x8x1xf32, #tpu.memory_space<vmem>>, %arg5: memref<8x1xf32, #tpu.memory_space<vmem>>, %arg6: memref<8x1xf32, #tpu.memory_space<vmem>>, %arg7: memref<8x1xf32, #tpu.memory_space<vmem>>) attributes {dimension_semantics = [#tpu.dimension_semantics<parallel>, #tpu.dimension_semantics<arbitrary>], iteration_bounds = array<i64: 1, 1>, scalar_prefetch = 0 : i64, scratch_operands = 3 : i64, tpu.core_type = #tpu.core_type<tc>, window_params = [{transform_indices = @transform_0, window_bounds = array<i64: 8, 8>}, {transform_indices = @transform_1, window_bounds = array<i64: 1, 8, 1>}, {transform_indices = @transform_2, window_bounds = array<i64: 1, 8, 1>}]} {
    %c0_i32 = arith.constant 0 : i32
    %0 = arith.cmpi eq, %arg1, %c0_i32 : i32
    %1 = arith.extui %0 : i1 to i32
    %c0_i32_0 = arith.constant 0 : i32
    %2 = arith.cmpi ne, %1, %c0_i32_0 : i32
    scf.if %2 {
      %cst_22 = arith.constant 0xFF800000 : f32
      %60 = vector.broadcast %cst_22 : f32 to vector<8x1xf32>
      %c0_23 = arith.constant 0 : index
      %c0_24 = arith.constant 0 : index
      %61 = vector.load %arg5[%c0_23, %c0_24] : memref<8x1xf32, #tpu.memory_space<vmem>>, vector<8x1xf32>
      tpu.vector_store %arg5[%c0_23, %c0_24], %60 {strides = array<i32>} : memref<8x1xf32, #tpu.memory_space<vmem>>, vector<8x1xf32>,
      %cst_25 = arith.constant 0.000000e+00 : f32
      %62 = vector.broadcast %cst_25 : f32 to vector<8x1xf32>
      %c0_26 = arith.constant 0 : index
      %c0_27 = arith.constant 0 : index
      %63 = vector.load %arg6[%c0_26, %c0_27] : memref<8x1xf32, #tpu.memory_space<vmem>>, vector<8x1xf32>
      tpu.vector_store %arg6[%c0_26, %c0_27], %62 {strides = array<i32>} : memref<8x1xf32, #tpu.memory_space<vmem>>, vector<8x1xf32>,
      %cst_28 = arith.constant 0.000000e+00 : f32
      %64 = vector.broadcast %cst_28 : f32 to vector<8x1xf32>
      %c0_29 = arith.constant 0 : index
      %c0_30 = arith.constant 0 : index
      %65 = vector.load %arg7[%c0_29, %c0_30] : memref<8x1xf32, #tpu.memory_space<vmem>>, vector<8x1xf32>
      tpu.vector_store %arg7[%c0_29, %c0_30], %64 {strides = array<i32>} : memref<8x1xf32, #tpu.memory_space<vmem>>, vector<8x1xf32>,
    } else {
    }
    %c0 = arith.constant 0 : index
    %c0_1 = arith.constant 0 : index
    %3 = vector.load %arg2[%c0, %c0_1] : memref<8x8xf32, #tpu.memory_space<vmem>>, vector<8x8xf32>
    %cst = arith.constant dense<0xFF800000> : vector<8xf32>
    %4 = vector.multi_reduction <maximumf>, %3, %cst [0] : vector<8x8xf32> to vector<8xf32>
    %5 = vector.shape_cast %4 : vector<8xf32> to vector<1x8xf32>
    %6 = vector.broadcast %5 : vector<1x8xf32> to vector<8x8xf32>
    %7 = arith.subf %3, %6 : vector<8x8xf32>
    %cst_2 = arith.constant 1.000000e-03 : f32
    %8 = vector.broadcast %cst_2 : f32 to vector<8x8xf32>
    %9 = arith.mulf %7, %8 : vector<8x8xf32>
    %10 = math.exp %9 : vector<8x8xf32>
    %cst_3 = arith.constant dense<0.000000e+00> : vector<8xf32>
    %11 = vector.multi_reduction <add>, %10, %cst_3 [0] : vector<8x8xf32> to vector<8xf32>
    %12 = vector.shape_cast %11 : vector<8xf32> to vector<1x8xf32>
    %cst_4 = arith.constant 8.000000e+00 : f32
    %13 = vector.broadcast %cst_4 : f32 to vector<1x8xf32>
    %14 = arith.divf %13, %12 : vector<1x8xf32>
    %15 = arith.mulf %3, %10 : vector<8x8xf32>
    %16 = vector.broadcast %14 : vector<1x8xf32> to vector<8x8xf32>
    %17 = arith.mulf %15, %16 : vector<8x8xf32>
    %c0_5 = arith.constant 0 : index
    %c0_6 = arith.constant 0 : index
    %18 = vector.load %arg5[%c0_5, %c0_6] : memref<8x1xf32, #tpu.memory_space<vmem>>, vector<8x1xf32>
    %cst_7 = arith.constant dense<0xFF800000> : vector<8xf32>
    %19 = vector.multi_reduction <maximumf>, %17, %cst_7 [1] : vector<8x8xf32> to vector<8xf32>
    %20 = vector.shape_cast %19 : vector<8xf32> to vector<8x1xf32>
    %21 = arith.maximumf %18, %20 : vector<8x1xf32>
    %c0_8 = arith.constant 0 : index
    %c0_9 = arith.constant 0 : index
    %22 = vector.load %arg6[%c0_8, %c0_9] : memref<8x1xf32, #tpu.memory_space<vmem>>, vector<8x1xf32>
    %23 = arith.subf %18, %21 : vector<8x1xf32>
    %24 = math.exp %23 : vector<8x1xf32>
    %25 = arith.mulf %22, %24 : vector<8x1xf32>
    %26 = vector.broadcast %21 : vector<8x1xf32> to vector<8x8xf32>
    %27 = arith.subf %17, %26 : vector<8x8xf32>
    %28 = math.exp %27 : vector<8x8xf32>
    %cst_10 = arith.constant dense<0.000000e+00> : vector<8xf32>
    %29 = vector.multi_reduction <add>, %28, %cst_10 [1] : vector<8x8xf32> to vector<8xf32>
    %30 = vector.shape_cast %29 : vector<8xf32> to vector<8x1xf32>
    %31 = arith.addf %25, %30 : vector<8x1xf32>
    %c0_11 = arith.constant 0 : index
    %c0_12 = arith.constant 0 : index
    %32 = vector.load %arg6[%c0_11, %c0_12] : memref<8x1xf32, #tpu.memory_space<vmem>>, vector<8x1xf32>
    tpu.vector_store %arg6[%c0_11, %c0_12], %31 {strides = array<i32>} : memref<8x1xf32, #tpu.memory_space<vmem>>, vector<8x1xf32>,
    %c0_13 = arith.constant 0 : index
    %c0_14 = arith.constant 0 : index
    %33 = vector.load %arg5[%c0_13, %c0_14] : memref<8x1xf32, #tpu.memory_space<vmem>>, vector<8x1xf32>
    tpu.vector_store %arg5[%c0_13, %c0_14], %21 {strides = array<i32>} : memref<8x1xf32, #tpu.memory_space<vmem>>, vector<8x1xf32>,
    %c1_i32 = arith.constant 1 : i32
    %34 = arith.muli %arg0, %c1_i32 : i32
    %35 = arith.addi %34, %arg1 : i32
    %c8_i32 = arith.constant 8 : i32
    %36 = arith.muli %35, %c8_i32 : i32
    %37 = tpu.assume_multiple %36, 8 : i32
    %38 = arith.index_cast %37 : i32 to index
    %c0_15 = arith.constant 0 : index
    %39 = vector.load %arg2[%38, %c0_15] : memref<8x8xf32, #tpu.memory_space<vmem>>, vector<8x8xf32>
    %40 = vector.broadcast %5 : vector<1x8xf32> to vector<8x8xf32>
    %41 = arith.subf %39, %40 : vector<8x8xf32>
    %cst_16 = arith.constant 1.000000e-03 : f32
    %42 = vector.broadcast %cst_16 : f32 to vector<8x8xf32>
    %43 = arith.mulf %41, %42 : vector<8x8xf32>
    %44 = math.exp %43 : vector<8x8xf32>
    %45 = arith.mulf %39, %44 : vector<8x8xf32>
    %46 = vector.broadcast %14 : vector<1x8xf32> to vector<8x8xf32>
    %47 = arith.mulf %45, %46 : vector<8x8xf32>
    %48 = tpu.iota {dimensions = array<i32: 0>} : vector<8x8xi32>
    %49 = tpu.iota {dimensions = array<i32: 1>} : vector<8x8xi32>
    %50 = arith.cmpi eq, %48, %49 : vector<8x8xi32>
    %cst_17 = arith.constant 0.000000e+00 : f32
    %51 = vector.broadcast %cst_17 : f32 to vector<8x8xf32>
    %52 = arith.select %50, %47, %51 : vector<8x8xi1>, vector<8x8xf32>
    %cst_18 = arith.constant dense<0.000000e+00> : vector<8xf32>
    %53 = vector.multi_reduction <add>, %52, %cst_18 [1] : vector<8x8xf32> to vector<8xf32>
    %54 = vector.shape_cast %53 : vector<8xf32> to vector<8x1xf32>
    %55 = arith.index_cast %37 : i32 to index
    %c0_19 = arith.constant 0 : index
    %56 = vector.load %arg7[%55, %c0_19] : memref<8x1xf32, #tpu.memory_space<vmem>>, vector<8x1xf32>
    tpu.vector_store %arg7[%55, %c0_19], %54 {strides = array<i32>} : memref<8x1xf32, #tpu.memory_space<vmem>>, vector<8x1xf32>,
    %c0_i32_20 = arith.constant 0 : i32
    %57 = arith.cmpi eq, %arg1, %c0_i32_20 : i32
    %58 = arith.extui %57 : i1 to i32
    %c0_i32_21 = arith.constant 0 : i32
    %59 = arith.cmpi ne, %58, %c0_i32_21 : i32
    scf.if %59 {
      %c0_22 = arith.constant 0 : index
      %c0_23 = arith.constant 0 : index
      %60 = vector.load %arg5[%c0_22, %c0_23] : memref<8x1xf32, #tpu.memory_space<vmem>>, vector<8x1xf32>
      %c0_24 = arith.constant 0 : index
      %c0_25 = arith.constant 0 : index
      %61 = vector.load %arg6[%c0_24, %c0_25] : memref<8x1xf32, #tpu.memory_space<vmem>>, vector<8x1xf32>
      %62 = math.log %61 : vector<8x1xf32>
      %63 = arith.addf %60, %62 : vector<8x1xf32>
      %64 = vector.shape_cast %63 : vector<8x1xf32> to vector<1x8x1xf32>
      %c0_26 = arith.constant 0 : index
      %c0_27 = arith.constant 0 : index
      %c0_28 = arith.constant 0 : index
      %65 = vector.load %arg3[%c0_26, %c0_27, %c0_28] : memref<1x8x1xf32, #tpu.memory_space<vmem>>, vector<1x8x1xf32>
      tpu.vector_store %arg3[%c0_26, %c0_27, %c0_28], %64 {strides = array<i32>} : memref<1x8x1xf32, #tpu.memory_space<vmem>>, vector<1x8x1xf32>,
      %c0_29 = arith.constant 0 : index
      %c0_30 = arith.constant 0 : index
      %66 = vector.load %arg7[%c0_29, %c0_30] : memref<8x1xf32, #tpu.memory_space<vmem>>, vector<8x1xf32>
      %67 = vector.shape_cast %66 : vector<8x1xf32> to vector<1x8x1xf32>
      %c0_31 = arith.constant 0 : index
      %c0_32 = arith.constant 0 : index
      %c0_33 = arith.constant 0 : index
      %68 = vector.load %arg4[%c0_31, %c0_32, %c0_33] : memref<1x8x1xf32, #tpu.memory_space<vmem>>, vector<1x8x1xf32>
      tpu.vector_store %arg4[%c0_31, %c0_32, %c0_33], %67 {strides = array<i32>} : memref<1x8x1xf32, #tpu.memory_space<vmem>>, vector<1x8x1xf32>,
    } else {
    }
    return
  }
  func.func @transform_0(%arg0: i32, %arg1: i32) -> (i32, i32) {
    %c1_i32 = arith.constant 1 : i32
    %0 = arith.muli %arg0, %c1_i32 : i32
    %1 = arith.addi %0, %arg1 : i32
    %c0_i32 = arith.constant 0 : i32
    %c0_i32_0 = arith.constant 0 : i32
    return %c0_i32, %1 : i32, i32
  }
  func.func @transform_1(%arg0: i32, %arg1: i32) -> (i32, i32, i32) {
    %c0_i32 = arith.constant 0 : i32
    %c0_i32_0 = arith.constant 0 : i32
    %c0_i32_1 = arith.constant 0 : i32
    return %arg0, %c0_i32, %c0_i32_0 : i32, i32, i32
  }
  func.func @transform_2(%arg0: i32, %arg1: i32) -> (i32, i32, i32) {
    %c0_i32 = arith.constant 0 : i32
    %c0_i32_0 = arith.constant 0 : i32
    %c0_i32_1 = arith.constant 0 : i32
    return %arg0, %c0_i32, %c0_i32_0 : i32, i32, i32
  }
}

</mosaic_0001>

<bundles_post_ra>
// kernel: tpu_custom_call.1
= control target key start
LH: loop header
LB: loop body
LE: loop exit
PB: predicated region body
PF: predicated region fallthrough
CT: control target
= control target key end

     0   :  { %8 = vsyncpa [#allocation6], 0  ;;  %s161_s9 = smov [#allocation5]   ;;  %s202_s0 = inlined_call_operand.hbm [shape: f32[8,8], index: 0, kind: input, shape index: {}]   ;;  %s203_s1 = inlined_call_operand.vmem [shape: f32[1,8,1], index: 1, kind: output, shape index: {0}]   ;;  %s204_s2 = inlined_call_operand.vmem [shape: f32[1,8,1], index: 2, kind: output, shape index: {1}]  }
   0x1   :  { %s18_s10 = sshll.u32 %s161_s9, 4  ;;  %s19_s10 = int_to_ptr.vmem [resolvable:$true] %s18_s10 }
   0x2   :  { %s147_s11 = scalar_lea.vmem %s19_s10, 128  ;;  %p152_p1 = scmp.lt.s32.totalorder %s19_s10, %s19_s10 }
   0x3   :  { %p148_p0 = scmp.ne.s32.totalorder %s19_s10, %s147_s11  ;;  %p153_p2 = scmp.lt.s32.totalorder %s147_s11, %s147_s11 }
   0x5   :  { %p154_p3 = por %p153_p2, %p152_p1 }
   0x7   :  { %p155_p4 = pnand %p154_p3, %p148_p0 }
   0x9   :  { %158 = shalt.err (!%p155_p4)
}
   0xa   :  { %21 = dma.hbm_to_vmem [thread:$0]  %s202_s0, 128, %s19_s10, [#allocation6]  }
   0xb   :  { %159 = dma.done.wait [#allocation6], 128  }
   0xc   :  { %160 = vsyncadd [#allocation6], 4294967168  ;;  %vm30_vm0 = vcmask 7168   ;;  %v162_v0 = vmov -inf   ;;  %vm35_vm1 = vcmask 64512   ;;  %v34_v1 = vld [vmem:[#allocation5] sm:$0xff]  ;;  %v93_v34 = vlaneseq }
   0xd   :  { %31 = vst.msk [vmem:[#allocation2] sm:$0xff] %vm30_vm0, %v162_v0  ;;  %v36_v2 = vsel %vm35_vm1, %v34_v1, -inf  ;;  %v163_v25 = vmov 0   ;;  %v164_v26 = vmov 0.0  }
   0xe   :  { %v37_v3 = vrot.slane %v36_v2, 4  ;;  %128 = vset.pattern.permute.xlu0 %v163_v25  ;;  %32 = vst.msk [vmem:[#allocation3] sm:$0xff] %vm30_vm0, %v164_v26  ;;  %33 = vst.msk [vmem:[#allocation4] sm:$0xff] %vm30_vm0, %v164_v26  ;;  %v94_v35 = vshrl.u32 %v93_v34, 7  ;;  %v96_v36 = vand.u32 127, %v93_v34 }
  0x10   :  { %v38_v4 = vmax.f32 %v36_v2, %v37_v3  ;;  %vm97_vm2 = vcmp.eq.s32.totalorder %v94_v35, %v96_v36 }
  0x12   :  { %v39_v5 = vrot.slane %v38_v4, 2 }
  0x14   :  { %v40_v6 = vmax.f32 %v38_v4, %v39_v5  ;;  %v58_v27 = vld [vmem:[#allocation2] sm:$0xff] }
  0x15   :  { %v63_v43 = vld [vmem:[#allocation3] sm:$0xff] }
  0x16   :  { %v41_v7 = vrot.slane %v40_v6, 1 }
  0x18   :  { %v42_v8 = vmax.f32 %v40_v6, %v41_v7 }
  0x1a   :  { %v43_v9 = vsub.f32 %v34_v1, %v42_v8 }
  0x1c   :  { %v44_v10 = vmul.f32 0.001, %v43_v9 }
  0x1e   :  { %v45_v11 = vmul.f32 1.442695, %v44_v10 }
  0x20   :  { %129 = vpow2.f32 %v45_v11 }
  0x2d   :  { %v130_v12 = vpop.eup %129 }
  0x2e   :  { %v47_v13 = vsel %vm35_vm1, %v130_v12, 0.0  ;;  %v56_v20 = vmul.f32 %v130_v12, %v34_v1 }
  0x2f   :  { %v48_v14 = vrot.slane %v47_v13, 4 }
  0x31   :  { %v49_v15 = vadd.f32 %v48_v14, %v47_v13 }
  0x33   :  { %v50_v16 = vrot.slane %v49_v15, 2 }
  0x35   :  { %v51_v17 = vadd.f32 %v50_v16, %v49_v15 }
  0x37   :  { %v52_v18 = vrot.slane %v51_v17, 1 }
  0x39   :  { %v53_v19 = vadd.f32 %v52_v18, %v51_v17 }
  0x3b   :  { %131 = vrcp.f32 %v53_v19 }
  0x48   :  { %v132_v21 = vpop.eup %131 }
  0x49   :  { %v55_v22 = vmul.f32 8.0, %v132_v21 }
  0x4b   :  { %v57_v23 = vmul.f32 %v56_v20, %v55_v22 }
  0x4d   :  { %v59_v24 = vsel %vm35_vm1, %v57_v23, -inf  ;;  %v98_v38 = vsel %vm97_vm2, %v57_v23, 0.0 }
  0x4e   :  { %60 = vmax.xlane.f32.xlu0 %v59_v24  ;;  %v99_v40 = vsel %vm35_vm1, %v98_v38, 0.0 }
  0xd7   :  { %v61_v28 = vpop.xlane.xlu0 %60 }
  0xd8   :  { %v62_v29 = vmax.f32 %v58_v27, %v61_v28 }
  0xda   :  { %v64_v30 = vsub.f32 %v58_v27, %v62_v29  ;;  %82 = vst.msk [vmem:[#allocation2] sm:$0xff] %vm30_vm0, %v62_v29  ;;  %70 = vperm.xlu0 %128, %v62_v29  }
  0xdc   :  { %v65_v41 = vmul.f32 1.442695, %v64_v30 }
  0xe1   :  { %v107_v52 = vld [vmem:[#allocation2] sm:$0xff] }
 0x155   :  { %v71_v31 = vpop.permute.xlu0 %70 }
 0x156   :  { %v73_v32 = vsub.f32 %v57_v23, %v71_v31 }
 0x158   :  { %v74_v33 = vmul.f32 1.442695, %v73_v32 }
 0x15a   :  { %133 = vpow2.f32 %v74_v33 }
 0x15b   :  { %135 = vpow2.f32 %v65_v41 }
 0x167   :  { %v134_v37 = vpop.eup %133 }
 0x168   :  { %v76_v39 = vsel %vm35_vm1, %v134_v37, 0.0  ;;  %v136_v42 = vpop.eup %135 }
 0x169   :  { %77 = vadd.xlane.f32.xlu1 %v76_v39  ;;  %v67_v44 = vmul.f32 %v136_v42, %v63_v43 }
 0x16d   :  { %100 = vadd.xlane.f32.xlu1 %v99_v40 }
 0x1f2   :  { %v78_v45 = vpop.xlane.xlu1 %77 }
 0x1f3   :  { %v79_v46 = vadd.f32 %v78_v45, %v67_v44 }
 0x1f5   :  { %81 = vst.msk [vmem:[#allocation3] sm:$0xff] %vm30_vm0, %v79_v46 }
 0x1f6   :  { %v101_v47 = vpop.xlane.xlu1 %100 }
 0x1f7   :  { %103 = vst.msk [vmem:[#allocation4] sm:$0xff] %vm30_vm0, %v101_v47 }
 0x1fc   :  { %v108_v48 = vld [vmem:[#allocation3] sm:$0xff] }
 0x1fd   :  { %137 = vlog2.f32 %v108_v48 }
 0x1fe   :  { %v113_v49 = vld [vmem:[#allocation4] sm:$0xff] }
 0x1ff   :  { %114 = vst.msk [vmem:[%s204_s2] sm:$0xff] %vm30_vm0, %v113_v49 }
 0x20a   :  { %v138_v50 = vpop.eup %137 }
 0x20b   :  { %v110_v51 = vmul.f32 0.6931472, %v138_v50 }
 0x20d   :  { %v111_v53 = vadd.f32 %v110_v51, %v107_v52 }
 0x20f   :  { %112 = vst.msk [vmem:[%s203_s1] sm:$0xff] %vm30_vm0, %v111_v53 }
 0x210   :  { %123 = vsyncpa [#allocation6], 1 }

</bundles_post_ra>
